<compile_context>
chip_gen: v5e
topology: v5e:2x2
jax: 0.10.0
libtpu: 0.0.40
codegen_flags: <defaults>
</compile_context>

<pallas_src>
import jax
import jax.numpy as jnp
import numpy as np
from jax.experimental import pallas as pl
from jax.experimental.pallas import tpu as pltpu


def _round_up(x: int, m: int) -> int:
    return ((x + m - 1) // m) * m


def _sub8(d: int) -> int:
    """Sublane-padded row count (second-to-last dim pads to a multiple of 8)."""
    return _round_up(d, 8)


def _tree_sum(terms):
    """Pairwise (tree) sum to expose ILP instead of a serial accumulate chain."""
    terms = list(terms)
    while len(terms) > 1:
        nxt = [terms[i] + terms[i + 1] for i in range(0, len(terms) - 1, 2)]
        if len(terms) % 2:
            nxt.append(terms[-1])
        terms = nxt
    return terms[0]


def _pick_node_tile(n, b, in_dim, out_dim, embed_dim, *,
                    max_node_tile=2048, vmem_budget_bytes=24 * (1 << 20)):
    """Node tile G: multiple of 128 lanes, capped by a lane-padded VMEM budget.

    Footprint accounts for double-buffered x, w1, b1 and the output block with
    their tiny second-to-last dims padded to 8 sublanes (what VMEM really holds).
    """
    def footprint(g):
        per_buf = (b * _sub8(in_dim)        # x block
                   + 2 * _sub8(embed_dim)   # w1 + b1 blocks
                   + b * _sub8(out_dim)     # output block
                   ) * g * 4
        return 2 * per_buf                  # double buffering

    g = min(max_node_tile, _round_up(n, 128))
    g = max(128, (g // 128) * 128)
    while g > 128 and footprint(g) > vmem_budget_bytes:
        g -= 128
    return g


def mf_dense_forward(x, w1, w2, b1, b2, *, max_node_tile: int = 2048):
    """x: [b, n, in_dim]; w1: [n, E]; w2: [E, in_dim*out_dim]; b1: [n, E]; b2: [E, out_dim].

    Returns [b, n, out_dim] float32, matching the PyTorch module's forward.
    """
    b, n, in_dim = x.shape
    embed_dim = w1.shape[1]
    out_dim = b2.shape[1]
    assert w1.shape == (n, embed_dim)
    assert w2.shape == (embed_dim, in_dim * out_dim)
    assert b1.shape == (n, embed_dim)
    assert b2.shape == (embed_dim, out_dim)

    f32 = jnp.float32
    # ---- lane-dense (nodes-on-lanes) layout --------------------------------
    x_t = jnp.transpose(x.astype(f32), (0, 2, 1))             # (b, in_dim, n)
    w1_t = jnp.transpose(w1.astype(f32))                       # (E, n)
    b1_t = jnp.transpose(b1.astype(f32))                       # (E, n)
    # w2 grouped per input-feature k so each (out_dim, E) coefficient block is
    # leading-dim indexed (no misaligned sublane slices in the kernel).
    w2_g = jnp.transpose(w2.astype(f32).reshape(embed_dim, in_dim, out_dim),
                         (1, 2, 0))                            # (in_dim, out_dim, E)
    b2_t = jnp.transpose(b2.astype(f32))                       # (out_dim, E)

    G = _pick_node_tile(n, b, in_dim, out_dim, embed_dim,
                        max_node_tile=max_node_tile)
    n_pad = _round_up(n, G)
    if n_pad != n:
        pad = n_pad - n
        x_t = jnp.pad(x_t, ((0, 0), (0, 0), (0, pad)))
        w1_t = jnp.pad(w1_t, ((0, 0), (0, pad)))
        b1_t = jnp.pad(b1_t, ((0, 0), (0, pad)))
    nt = n_pad // G

    def factor(coef, basis):
        # (rows, E) @ (E, G) -> (rows, G)
        if embed_dim >= 8:
            # Moderate/large E: use the MXU; HIGHEST keeps f32 accuracy.
            return jnp.dot(coef, basis, preferred_element_type=jnp.float32,
                           precision=jax.lax.Precision.HIGHEST)
        # Tiny rank: exact-f32 rank-1 terms, tree-summed (no serial chain).
        return _tree_sum([coef[:, e:e + 1] * basis[e:e + 1, :]
                          for e in range(embed_dim)])

    def kernel(x_ref, w1_ref, b1_ref, w2_ref, b2_ref, o_ref):
        w1_blk = w1_ref[...]                 # (E, G)   nodes on lanes
        b1_blk = b1_ref[...]                 # (E, G)

        # Fused low-rank factorization for this node tile, computed ONCE
        # (batch is folded into the block, so no per-batch recompute, and the
        # full (n, in_dim, out_dim) weight tensor never touches HBM).
        bias = factor(b2_ref[...], b1_blk)                       # (out_dim, G)
        w_k = [factor(w2_ref[k], w1_blk) for k in range(in_dim)]  # in_dim x (out_dim, G)

        # out[bb, o, g] = bias[o, g] + sum_k x[bb, k, g] * w_k[k][o, g]
        x_blk = x_ref[...]                   # (b, in_dim, G)
        terms = [x_blk[:, k:k + 1, :] * w_k[k][None, :, :] for k in range(in_dim)]
        acc = _tree_sum(terms) + bias[None, :, :]                # (b, out_dim, G)
        o_ref[...] = acc.astype(o_ref.dtype)

    flops = (nt * 2 * embed_dim * (in_dim * out_dim + out_dim) * G  # factorization
             + 2 * b * n_pad * in_dim * out_dim)                    # contraction
    # Sublane-padded HBM traffic of the lane-dense layout.
    bytes_accessed = 4 * (b * _sub8(in_dim) * n_pad        # x read
                          + b * _sub8(out_dim) * n_pad     # out write
                          + 2 * _sub8(embed_dim) * n_pad   # w1 + b1
                          + in_dim * _sub8(out_dim) * 128  # w2 (tiny, resident)
                          + _sub8(out_dim) * 128)          # b2 (tiny, resident)

    out_t = pl.pallas_call(
        kernel,
        out_shape=jax.ShapeDtypeStruct((b, out_dim, n_pad), jnp.float32),
        grid=(nt,),
        in_specs=[
            pl.BlockSpec((b, in_dim, G), lambda t: (0, 0, t)),              # x tile
            pl.BlockSpec((embed_dim, G), lambda t: (0, t)),                 # w1 tile
            pl.BlockSpec((embed_dim, G), lambda t: (0, t)),                 # b1 tile
            pl.BlockSpec((in_dim, out_dim, embed_dim), lambda t: (0, 0, 0)),  # w2 (resident)
            pl.BlockSpec((out_dim, embed_dim), lambda t: (0, 0)),             # b2 (resident)
        ],
        out_specs=pl.BlockSpec((b, out_dim, G), lambda t: (0, 0, t)),
        compiler_params=pltpu.CompilerParams(
            # Node tiles are independent -> megacore can shard them on v7x.
            dimension_semantics=("parallel",),
            # Tile picker keeps the real (lane-padded) footprint <= 24 MiB, so
            # 40 MiB is comfortable headroom and stays under v7x's 64 MiB VMEM.
            vmem_limit_bytes=40 * 1024 * 1024,
        ),
        cost_estimate=pl.CostEstimate(
            flops=flops, transcendentals=0, bytes_accessed=bytes_accessed),
    )(x_t, w1_t, b1_t, w2_g, b2_t)

    # Slice off node padding and restore the module's [b, n, out_dim] layout.
    return jnp.transpose(out_t[:, :, :n], (0, 2, 1))


def init_params(key, num_nodes, embed_dim, in_dim, out_dim):
    """Deterministic re-implementation of the module's reset_parameters()."""
    k1, k2, k3, k4 = jax.random.split(key, 4)

    def xavier_normal(k, shape):
        fan_out, fan_in = shape  # PyTorch 2-D convention: (size(0), size(1))
        std = (2.0 / (fan_in + fan_out)) ** 0.5
        return std * jax.random.normal(k, shape, dtype=jnp.float32)

    w1 = xavier_normal(k1, (num_nodes, embed_dim))
    w2 = xavier_normal(k2, (embed_dim, in_dim * out_dim))
    b1 = jax.random.uniform(k3, (num_nodes, embed_dim), dtype=jnp.float32)
    b2 = jax.random.uniform(k4, (embed_dim, out_dim), dtype=jnp.float32)
    return w1, w2, b1, b2


if __name__ == "__main__":
    # Small shapes consistent with the module's forward: x is [b, n, in_dim].
    batch, num_nodes, embed_dim, in_dim, out_dim = 2, 64, 3, 4, 6

    key = jax.random.PRNGKey(0)
    kx, kp = jax.random.split(key)
    x = jax.random.normal(kx, (batch, num_nodes, in_dim), dtype=jnp.float32)
    w1, w2, b1, b2 = init_params(kp, num_nodes, embed_dim, in_dim, out_dim)

    fwd = jax.jit(mf_dense_forward)
    out = jax.block_until_ready(fwd(x, w1, w2, b1, b2))

    # Reference in float64 numpy (independent of TPU matmul precision).
    xn, w1n, w2n, b1n, b2n = (np.asarray(a, dtype=np.float64)
                              for a in (x, w1, w2, b1, b2))
    weight_ref = (w1n @ w2n).reshape(num_nodes, in_dim, out_dim)
    bias_ref = (b1n @ b2n).reshape(num_nodes, out_dim)
    ref = np.einsum('ijk,jkl->ijl', xn, weight_ref) + bias_ref

    assert out.shape == (batch, num_nodes, out_dim)
    assert np.allclose(np.asarray(out, dtype=np.float64), ref, atol=1e-5, rtol=1e-5)
    # TODO(synk): the module stores an `activation` attribute but never applies
    # it in forward(); matching that, no activation is applied here.
    print("KERNEL_OK")
</pallas_src>

<mosaic_0001>
module attributes {stable_mosaic.version = 11 : i64} {
  func.func @kernel(%arg0: i32, %arg1: memref<2x4x128xf32, #tpu.memory_space<vmem>>, %arg2: memref<3x128xf32, #tpu.memory_space<vmem>>, %arg3: memref<3x128xf32, #tpu.memory_space<vmem>>, %arg4: memref<4x6x3xf32, #tpu.memory_space<vmem>>, %arg5: memref<6x3xf32, #tpu.memory_space<vmem>>, %arg6: memref<2x6x128xf32, #tpu.memory_space<vmem>>) attributes {dimension_semantics = [#tpu.dimension_semantics<parallel>], iteration_bounds = array<i64: 1>, scalar_prefetch = 0 : i64, scratch_operands = 0 : i64, tpu.core_type = #tpu.core_type<tc>, window_params = [{transform_indices = @transform_0, window_bounds = array<i64: 2, 4, 128>}, {transform_indices = @transform_1, window_bounds = array<i64: 3, 128>}, {transform_indices = @transform_2, window_bounds = array<i64: 3, 128>}, {pipeline_mode = #tpu.pipeline_mode<synchronous>, transform_indices = @transform_3, window_bounds = array<i64: 4, 6, 3>}, {pipeline_mode = #tpu.pipeline_mode<synchronous>, transform_indices = @transform_4, window_bounds = array<i64: 6, 3>}, {transform_indices = @transform_5, window_bounds = array<i64: 2, 6, 128>}]} {
    %c0 = arith.constant 0 : index
    %c0_0 = arith.constant 0 : index
    %0 = vector.load %arg2[%c0, %c0_0] : memref<3x128xf32, #tpu.memory_space<vmem>>, vector<3x128xf32>
    %c0_1 = arith.constant 0 : index
    %c0_2 = arith.constant 0 : index
    %1 = vector.load %arg3[%c0_1, %c0_2] : memref<3x128xf32, #tpu.memory_space<vmem>>, vector<3x128xf32>
    %c0_3 = arith.constant 0 : index
    %c0_4 = arith.constant 0 : index
    %2 = vector.load %arg5[%c0_3, %c0_4] : memref<6x3xf32, #tpu.memory_space<vmem>>, vector<6x3xf32>
    %3 = vector.extract_strided_slice %2 {offsets = [0, 0], sizes = [6, 1], strides = [1, 1]} : vector<6x3xf32> to vector<6x1xf32>
    %4 = vector.extract_strided_slice %1 {offsets = [0, 0], sizes = [1, 128], strides = [1, 1]} : vector<3x128xf32> to vector<1x128xf32>
    %5 = vector.broadcast %3 : vector<6x1xf32> to vector<6x128xf32>
    %6 = vector.broadcast %4 : vector<1x128xf32> to vector<6x128xf32>
    %7 = arith.mulf %5, %6 : vector<6x128xf32>
    %8 = vector.extract_strided_slice %2 {offsets = [0, 1], sizes = [6, 1], strides = [1, 1]} : vector<6x3xf32> to vector<6x1xf32>
    %9 = vector.extract_strided_slice %1 {offsets = [1, 0], sizes = [1, 128], strides = [1, 1]} : vector<3x128xf32> to vector<1x128xf32>
    %10 = vector.broadcast %8 : vector<6x1xf32> to vector<6x128xf32>
    %11 = vector.broadcast %9 : vector<1x128xf32> to vector<6x128xf32>
    %12 = arith.mulf %10, %11 : vector<6x128xf32>
    %13 = vector.extract_strided_slice %2 {offsets = [0, 2], sizes = [6, 1], strides = [1, 1]} : vector<6x3xf32> to vector<6x1xf32>
    %14 = vector.extract_strided_slice %1 {offsets = [2, 0], sizes = [1, 128], strides = [1, 1]} : vector<3x128xf32> to vector<1x128xf32>
    %15 = vector.broadcast %13 : vector<6x1xf32> to vector<6x128xf32>
    %16 = vector.broadcast %14 : vector<1x128xf32> to vector<6x128xf32>
    %17 = arith.mulf %15, %16 : vector<6x128xf32>
    %18 = arith.addf %7, %12 : vector<6x128xf32>
    %19 = arith.addf %18, %17 : vector<6x128xf32>
    %c0_5 = arith.constant 0 : index
    %c0_6 = arith.constant 0 : index
    %c0_7 = arith.constant 0 : index
    %20 = vector.load %arg4[%c0_5, %c0_6, %c0_7] : memref<4x6x3xf32, #tpu.memory_space<vmem>>, vector<1x6x3xf32>
    %21 = vector.shape_cast %20 : vector<1x6x3xf32> to vector<6x3xf32>
    %22 = vector.extract_strided_slice %21 {offsets = [0, 0], sizes = [6, 1], strides = [1, 1]} : vector<6x3xf32> to vector<6x1xf32>
    %23 = vector.extract_strided_slice %0 {offsets = [0, 0], sizes = [1, 128], strides = [1, 1]} : vector<3x128xf32> to vector<1x128xf32>
    %24 = vector.broadcast %22 : vector<6x1xf32> to vector<6x128xf32>
    %25 = vector.broadcast %23 : vector<1x128xf32> to vector<6x128xf32>
    %26 = arith.mulf %24, %25 : vector<6x128xf32>
    %27 = vector.extract_strided_slice %21 {offsets = [0, 1], sizes = [6, 1], strides = [1, 1]} : vector<6x3xf32> to vector<6x1xf32>
    %28 = vector.extract_strided_slice %0 {offsets = [1, 0], sizes = [1, 128], strides = [1, 1]} : vector<3x128xf32> to vector<1x128xf32>
    %29 = vector.broadcast %27 : vector<6x1xf32> to vector<6x128xf32>
    %30 = vector.broadcast %28 : vector<1x128xf32> to vector<6x128xf32>
    %31 = arith.mulf %29, %30 : vector<6x128xf32>
    %32 = vector.extract_strided_slice %21 {offsets = [0, 2], sizes = [6, 1], strides = [1, 1]} : vector<6x3xf32> to vector<6x1xf32>
    %33 = vector.extract_strided_slice %0 {offsets = [2, 0], sizes = [1, 128], strides = [1, 1]} : vector<3x128xf32> to vector<1x128xf32>
    %34 = vector.broadcast %32 : vector<6x1xf32> to vector<6x128xf32>
    %35 = vector.broadcast %33 : vector<1x128xf32> to vector<6x128xf32>
    %36 = arith.mulf %34, %35 : vector<6x128xf32>
    %37 = arith.addf %26, %31 : vector<6x128xf32>
    %38 = arith.addf %37, %36 : vector<6x128xf32>
    %c1 = arith.constant 1 : index
    %c0_8 = arith.constant 0 : index
    %c0_9 = arith.constant 0 : index
    %39 = vector.load %arg4[%c1, %c0_8, %c0_9] : memref<4x6x3xf32, #tpu.memory_space<vmem>>, vector<1x6x3xf32>
    %40 = vector.shape_cast %39 : vector<1x6x3xf32> to vector<6x3xf32>
    %41 = vector.extract_strided_slice %40 {offsets = [0, 0], sizes = [6, 1], strides = [1, 1]} : vector<6x3xf32> to vector<6x1xf32>
    %42 = vector.extract_strided_slice %0 {offsets = [0, 0], sizes = [1, 128], strides = [1, 1]} : vector<3x128xf32> to vector<1x128xf32>
    %43 = vector.broadcast %41 : vector<6x1xf32> to vector<6x128xf32>
    %44 = vector.broadcast %42 : vector<1x128xf32> to vector<6x128xf32>
    %45 = arith.mulf %43, %44 : vector<6x128xf32>
    %46 = vector.extract_strided_slice %40 {offsets = [0, 1], sizes = [6, 1], strides = [1, 1]} : vector<6x3xf32> to vector<6x1xf32>
    %47 = vector.extract_strided_slice %0 {offsets = [1, 0], sizes = [1, 128], strides = [1, 1]} : vector<3x128xf32> to vector<1x128xf32>
    %48 = vector.broadcast %46 : vector<6x1xf32> to vector<6x128xf32>
    %49 = vector.broadcast %47 : vector<1x128xf32> to vector<6x128xf32>
    %50 = arith.mulf %48, %49 : vector<6x128xf32>
    %51 = vector.extract_strided_slice %40 {offsets = [0, 2], sizes = [6, 1], strides = [1, 1]} : vector<6x3xf32> to vector<6x1xf32>
    %52 = vector.extract_strided_slice %0 {offsets = [2, 0], sizes = [1, 128], strides = [1, 1]} : vector<3x128xf32> to vector<1x128xf32>
    %53 = vector.broadcast %51 : vector<6x1xf32> to vector<6x128xf32>
    %54 = vector.broadcast %52 : vector<1x128xf32> to vector<6x128xf32>
    %55 = arith.mulf %53, %54 : vector<6x128xf32>
    %56 = arith.addf %45, %50 : vector<6x128xf32>
    %57 = arith.addf %56, %55 : vector<6x128xf32>
    %c2 = arith.constant 2 : index
    %c0_10 = arith.constant 0 : index
    %c0_11 = arith.constant 0 : index
    %58 = vector.load %arg4[%c2, %c0_10, %c0_11] : memref<4x6x3xf32, #tpu.memory_space<vmem>>, vector<1x6x3xf32>
    %59 = vector.shape_cast %58 : vector<1x6x3xf32> to vector<6x3xf32>
    %60 = vector.extract_strided_slice %59 {offsets = [0, 0], sizes = [6, 1], strides = [1, 1]} : vector<6x3xf32> to vector<6x1xf32>
    %61 = vector.extract_strided_slice %0 {offsets = [0, 0], sizes = [1, 128], strides = [1, 1]} : vector<3x128xf32> to vector<1x128xf32>
    %62 = vector.broadcast %60 : vector<6x1xf32> to vector<6x128xf32>
    %63 = vector.broadcast %61 : vector<1x128xf32> to vector<6x128xf32>
    %64 = arith.mulf %62, %63 : vector<6x128xf32>
    %65 = vector.extract_strided_slice %59 {offsets = [0, 1], sizes = [6, 1], strides = [1, 1]} : vector<6x3xf32> to vector<6x1xf32>
    %66 = vector.extract_strided_slice %0 {offsets = [1, 0], sizes = [1, 128], strides = [1, 1]} : vector<3x128xf32> to vector<1x128xf32>
    %67 = vector.broadcast %65 : vector<6x1xf32> to vector<6x128xf32>
    %68 = vector.broadcast %66 : vector<1x128xf32> to vector<6x128xf32>
    %69 = arith.mulf %67, %68 : vector<6x128xf32>
    %70 = vector.extract_strided_slice %59 {offsets = [0, 2], sizes = [6, 1], strides = [1, 1]} : vector<6x3xf32> to vector<6x1xf32>
    %71 = vector.extract_strided_slice %0 {offsets = [2, 0], sizes = [1, 128], strides = [1, 1]} : vector<3x128xf32> to vector<1x128xf32>
    %72 = vector.broadcast %70 : vector<6x1xf32> to vector<6x128xf32>
    %73 = vector.broadcast %71 : vector<1x128xf32> to vector<6x128xf32>
    %74 = arith.mulf %72, %73 : vector<6x128xf32>
    %75 = arith.addf %64, %69 : vector<6x128xf32>
    %76 = arith.addf %75, %74 : vector<6x128xf32>
    %c3 = arith.constant 3 : index
    %c0_12 = arith.constant 0 : index
    %c0_13 = arith.constant 0 : index
    %77 = vector.load %arg4[%c3, %c0_12, %c0_13] : memref<4x6x3xf32, #tpu.memory_space<vmem>>, vector<1x6x3xf32>
    %78 = vector.shape_cast %77 : vector<1x6x3xf32> to vector<6x3xf32>
    %79 = vector.extract_strided_slice %78 {offsets = [0, 0], sizes = [6, 1], strides = [1, 1]} : vector<6x3xf32> to vector<6x1xf32>
    %80 = vector.extract_strided_slice %0 {offsets = [0, 0], sizes = [1, 128], strides = [1, 1]} : vector<3x128xf32> to vector<1x128xf32>
    %81 = vector.broadcast %79 : vector<6x1xf32> to vector<6x128xf32>
    %82 = vector.broadcast %80 : vector<1x128xf32> to vector<6x128xf32>
    %83 = arith.mulf %81, %82 : vector<6x128xf32>
    %84 = vector.extract_strided_slice %78 {offsets = [0, 1], sizes = [6, 1], strides = [1, 1]} : vector<6x3xf32> to vector<6x1xf32>
    %85 = vector.extract_strided_slice %0 {offsets = [1, 0], sizes = [1, 128], strides = [1, 1]} : vector<3x128xf32> to vector<1x128xf32>
    %86 = vector.broadcast %84 : vector<6x1xf32> to vector<6x128xf32>
    %87 = vector.broadcast %85 : vector<1x128xf32> to vector<6x128xf32>
    %88 = arith.mulf %86, %87 : vector<6x128xf32>
    %89 = vector.extract_strided_slice %78 {offsets = [0, 2], sizes = [6, 1], strides = [1, 1]} : vector<6x3xf32> to vector<6x1xf32>
    %90 = vector.extract_strided_slice %0 {offsets = [2, 0], sizes = [1, 128], strides = [1, 1]} : vector<3x128xf32> to vector<1x128xf32>
    %91 = vector.broadcast %89 : vector<6x1xf32> to vector<6x128xf32>
    %92 = vector.broadcast %90 : vector<1x128xf32> to vector<6x128xf32>
    %93 = arith.mulf %91, %92 : vector<6x128xf32>
    %94 = arith.addf %83, %88 : vector<6x128xf32>
    %95 = arith.addf %94, %93 : vector<6x128xf32>
    %c0_14 = arith.constant 0 : index
    %c0_15 = arith.constant 0 : index
    %c0_16 = arith.constant 0 : index
    %96 = vector.load %arg1[%c0_14, %c0_15, %c0_16] : memref<2x4x128xf32, #tpu.memory_space<vmem>>, vector<2x4x128xf32>
    %97 = vector.extract_strided_slice %96 {offsets = [0, 0, 0], sizes = [2, 1, 128], strides = [1, 1, 1]} : vector<2x4x128xf32> to vector<2x1x128xf32>
    %98 = vector.shape_cast %38 : vector<6x128xf32> to vector<1x6x128xf32>
    %99 = vector.broadcast %97 : vector<2x1x128xf32> to vector<2x6x128xf32>
    %100 = vector.broadcast %98 : vector<1x6x128xf32> to vector<2x6x128xf32>
    %101 = arith.mulf %99, %100 : vector<2x6x128xf32>
    %102 = vector.extract_strided_slice %96 {offsets = [0, 1, 0], sizes = [2, 1, 128], strides = [1, 1, 1]} : vector<2x4x128xf32> to vector<2x1x128xf32>
    %103 = vector.shape_cast %57 : vector<6x128xf32> to vector<1x6x128xf32>
    %104 = vector.broadcast %102 : vector<2x1x128xf32> to vector<2x6x128xf32>
    %105 = vector.broadcast %103 : vector<1x6x128xf32> to vector<2x6x128xf32>
    %106 = arith.mulf %104, %105 : vector<2x6x128xf32>
    %107 = vector.extract_strided_slice %96 {offsets = [0, 2, 0], sizes = [2, 1, 128], strides = [1, 1, 1]} : vector<2x4x128xf32> to vector<2x1x128xf32>
    %108 = vector.shape_cast %76 : vector<6x128xf32> to vector<1x6x128xf32>
    %109 = vector.broadcast %107 : vector<2x1x128xf32> to vector<2x6x128xf32>
    %110 = vector.broadcast %108 : vector<1x6x128xf32> to vector<2x6x128xf32>
    %111 = arith.mulf %109, %110 : vector<2x6x128xf32>
    %112 = vector.extract_strided_slice %96 {offsets = [0, 3, 0], sizes = [2, 1, 128], strides = [1, 1, 1]} : vector<2x4x128xf32> to vector<2x1x128xf32>
    %113 = vector.shape_cast %95 : vector<6x128xf32> to vector<1x6x128xf32>
    %114 = vector.broadcast %112 : vector<2x1x128xf32> to vector<2x6x128xf32>
    %115 = vector.broadcast %113 : vector<1x6x128xf32> to vector<2x6x128xf32>
    %116 = arith.mulf %114, %115 : vector<2x6x128xf32>
    %117 = arith.addf %101, %106 : vector<2x6x128xf32>
    %118 = arith.addf %111, %116 : vector<2x6x128xf32>
    %119 = arith.addf %117, %118 : vector<2x6x128xf32>
    %120 = vector.shape_cast %19 : vector<6x128xf32> to vector<1x6x128xf32>
    %121 = vector.broadcast %120 : vector<1x6x128xf32> to vector<2x6x128xf32>
    %122 = arith.addf %119, %121 : vector<2x6x128xf32>
    %c0_17 = arith.constant 0 : index
    %c0_18 = arith.constant 0 : index
    %c0_19 = arith.constant 0 : index
    %123 = vector.load %arg6[%c0_17, %c0_18, %c0_19] : memref<2x6x128xf32, #tpu.memory_space<vmem>>, vector<2x6x128xf32>
    tpu.vector_store %arg6[%c0_17, %c0_18, %c0_19], %122 {strides = array<i32>} : memref<2x6x128xf32, #tpu.memory_space<vmem>>, vector<2x6x128xf32>,
    return
  }
  func.func @transform_0(%arg0: i32) -> (i32, i32, i32) {
    %c0_i32 = arith.constant 0 : i32
    %c0_i32_0 = arith.constant 0 : i32
    %c0_i32_1 = arith.constant 0 : i32
    return %c0_i32, %c0_i32_0, %arg0 : i32, i32, i32
  }
  func.func @transform_1(%arg0: i32) -> (i32, i32) {
    %c0_i32 = arith.constant 0 : i32
    %c0_i32_0 = arith.constant 0 : i32
    return %c0_i32, %arg0 : i32, i32
  }
  func.func @transform_2(%arg0: i32) -> (i32, i32) {
    %c0_i32 = arith.constant 0 : i32
    %c0_i32_0 = arith.constant 0 : i32
    return %c0_i32, %arg0 : i32, i32
  }
  func.func @transform_3(%arg0: i32) -> (i32, i32, i32) {
    %c0_i32 = arith.constant 0 : i32
    %c0_i32_0 = arith.constant 0 : i32
    %c0_i32_1 = arith.constant 0 : i32
    %c0_i32_2 = arith.constant 0 : i32
    return %c0_i32, %c0_i32_0, %c0_i32_1 : i32, i32, i32
  }
  func.func @transform_4(%arg0: i32) -> (i32, i32) {
    %c0_i32 = arith.constant 0 : i32
    %c0_i32_0 = arith.constant 0 : i32
    %c0_i32_1 = arith.constant 0 : i32
    return %c0_i32, %c0_i32_0 : i32, i32
  }
  func.func @transform_5(%arg0: i32) -> (i32, i32, i32) {
    %c0_i32 = arith.constant 0 : i32
    %c0_i32_0 = arith.constant 0 : i32
    %c0_i32_1 = arith.constant 0 : i32
    return %c0_i32, %c0_i32_0, %arg0 : i32, i32, i32
  }
}

</mosaic_0001>

<bundles_post_ra>
// kernel: mf_dense_forward.1
= control target key start
LH: loop header
LB: loop body
LE: loop exit
PB: predicated region body
PF: predicated region fallthrough
CT: control target
= control target key end

     0   :  { %v176_v0 = vmov 2   ;;  %v177_v1 = vmov 1   ;;  %v178_v4 = vmov 0   ;;  %s245_s4 = inlined_call_operand.vmem [shape: f32[6,3], index: 4, kind: input, shape index: {}]   ;;  %s246_s3 = inlined_call_operand.vmem [shape: f32[4,6,3], index: 3, kind: input, shape index: {}]   ;;  %s247_s1 = inlined_call_operand.vmem [shape: f32[3,128], index: 1, kind: input, shape index: {}]   ;;  %s248_s2 = inlined_call_operand.vmem [shape: f32[3,128], index: 2, kind: input, shape index: {}]   ;;  %s249_s0 = inlined_call_operand.vmem [shape: f32[2,4,128], index: 0, kind: input, shape index: {}]   ;;  %s250_s5 = inlined_call_operand.vmem [shape: f32[2,6,128], index: 5, kind: output, shape index: {}]  }
   0x1   :  { %166 = vset.pattern.permute.xlu1 %v176_v0  ;;  %164 = vset.pattern.permute.xlu0 %v177_v1  ;;  %v22_v2 = vld [vmem:[%s245_s4] sm:$0x3f]  ;;  %v158_v5 = vld [vmem:[%s246_s3 + $0x8] sm:$0x3f]  ;;  %v159_v6 = vld [vmem:[%s246_s3 + $0x10] sm:$0x3f] }
   0x2   :  { %v44_v3 = vld [vmem:[%s246_s3] sm:$0x3f]  ;;  %37 = vperm.xlu1 %166, %v22_v2   ;;  %31 = vperm.xlu0 %164, %v22_v2   ;;  %v160_v7 = vld [vmem:[%s246_s3 + $0x18] sm:$0x3f] }
   0x3   :  { %168 = vset.pattern.permute.xlu2 %v177_v1  ;;  %v20_v19 = vld [vmem:[%s247_s1] sm:$0x7]  ;;  %v127_v34 = vld [vmem:[%s249_s0 + $0x4] sm:$0xf] }
   0x4   :  { %53 = vperm.xlu2 %168, %v44_v3   ;;  %v50_v20 = vperm.slane %v20_v19, 0  ;;  %v56_v21 = vperm.slane %v20_v19, 1  ;;  %v62_v25 = vperm.slane %v20_v19, 2  ;;  %v21_v32 = vld [vmem:[%s248_s2] sm:$0x7]  ;;  %v129_v46 = vperm.slane %v127_v34, 0 }
   0x5   :  { %v126_v33 = vld [vmem:[%s249_s0] sm:$0xf]  ;;  %v34_v38 = vperm.slane %v21_v32, 1  ;;  %v28_v39 = vperm.slane %v21_v32, 0  ;;  %v133_v49 = vperm.slane %v127_v34, 1  ;;  %v137_v51 = vperm.slane %v127_v34, 2 }
   0x6   :  { %v128_v45 = vperm.slane %v126_v33, 0  ;;  %v132_v47 = vperm.slane %v126_v33, 1  ;;  %v136_v50 = vperm.slane %v126_v33, 2  ;;  %v140_v56 = vperm.slane %v126_v33, 3 }
   0x7   :  { %v141_v60 = vperm.slane %v127_v34, 3  ;;  %v40_v61 = vperm.slane %v21_v32, 2 }
   0xa   :  { %167 = vset.pattern.permute.xlu1 %v178_v4  ;;  %165 = vset.pattern.permute.xlu0 %v178_v4 }
   0xb   :  { %25 = vperm.xlu0 %165, %v22_v2   ;;  %47 = vperm.xlu1 %167, %v44_v3  }
   0xc   :  { %169 = vset.pattern.permute.xlu2 %v176_v0 }
   0xd   :  { %59 = vperm.xlu2 %169, %v44_v3  }
  0x13   :  { %70 = vperm.xlu1 %167, %v158_v5   ;;  %90 = vperm.xlu0 %165, %v159_v6  }
  0x15   :  { %170 = vset.pattern.permute.xlu2 %v177_v1 }
  0x16   :  { %75 = vperm.xlu2 %170, %v158_v5  }
  0x1b   :  { %171 = vset.pattern.permute.xlu1 %v177_v1  ;;  %174 = vset.pattern.permute.xlu0 %v176_v0 }
  0x1c   :  { %95 = vperm.xlu1 %171, %v159_v6   ;;  %100 = vperm.xlu0 %174, %v159_v6  }
  0x1e   :  { %172 = vset.pattern.permute.xlu2 %v178_v4 }
  0x1f   :  { %110 = vperm.xlu2 %172, %v160_v7  }
  0x24   :  { %115 = vperm.xlu1 %171, %v160_v7  }
  0x27   :  { %173 = vset.pattern.permute.xlu2 %v176_v0 }
  0x28   :  { %80 = vperm.xlu2 %173, %v158_v5  }
  0x2c   :  { %175 = vset.pattern.permute.xlu1 %v176_v0 }
  0x2d   :  { %120 = vperm.xlu1 %175, %v160_v7  }
  0x5e   :  { %v54_v8 = vpop.permute.xlu2 %53 }
  0x5f   :  { %v57_v30 = vmul.f32 %v56_v21, %v54_v8 }
  0x67   :  { %v60_v10 = vpop.permute.xlu2 %59 }
  0x68   :  { %v63_v37 = vmul.f32 %v62_v25, %v60_v10 }
  0x70   :  { %v76_v13 = vpop.permute.xlu2 %75 }
  0x71   :  { %v78_v22 = vmul.f32 %v76_v13, %v56_v21 }
  0x74   :  { %v224_v9 = vpop.permute.xlu1 %37  ;;  %v32_v11 = vpop.permute.xlu0 %31 }
  0x75   :  { %v35_v52 = vmul.f32 %v34_v38, %v32_v11  ;;  %v41_v8 = vmul.f32 %v40_v61, %v224_v9 }
  0x79   :  { %v111_v16 = vpop.permute.xlu2 %110 }
  0x7a   :  { %v113_v41 = vmul.f32 %v111_v16, %v50_v20 }
  0x7d   :  { %v48_v12 = vpop.permute.xlu1 %47  ;;  %v26_v15 = vpop.permute.xlu0 %25 }
  0x7e   :  { %v51_v26 = vmul.f32 %v50_v20, %v48_v12  ;;  %v29_v53 = vmul.f32 %v28_v39, %v26_v15 }
  0x80   :  { %v64_v40 = vadd.f32 %v57_v30, %v51_v26  ;;  %v42_v1 = vadd.f32 %v35_v52, %v29_v53 }
  0x82   :  { %v81_v27 = vpop.permute.xlu2 %80  ;;  %v65_v54 = vadd.f32 %v64_v40, %v63_v37 }
  0x83   :  { %v83_v36 = vmul.f32 %v81_v27, %v62_v25 }
  0x84   :  { %v130_v2 = vmul.f32 %v128_v45, %v65_v54  ;;  %v131_v3 = vmul.f32 %v129_v46, %v65_v54 }
  0x85   :  { %v71_v14 = vpop.permute.xlu1 %70  ;;  %v91_v18 = vpop.permute.xlu0 %90 }
  0x86   :  { %v73_v23 = vmul.f32 %v71_v14, %v50_v20  ;;  %v93_v28 = vmul.f32 %v91_v18, %v50_v20  ;;  %v43_v14 = vadd.f32 %v42_v1, %v41_v8 }
  0x88   :  { %v84_v35 = vadd.f32 %v78_v22, %v73_v23 }
  0x8a   :  { %v85_v48 = vadd.f32 %v84_v35, %v83_v36 }
  0x8c   :  { %v134_v62 = vmul.f32 %v132_v47, %v85_v48  ;;  %v135_v63 = vmul.f32 %v133_v49, %v85_v48 }
  0x8e   :  { %v96_v17 = vpop.permute.xlu1 %95  ;;  %v101_v31 = vpop.permute.xlu0 %100  ;;  %v144_v10 = vadd.f32 %v134_v62, %v130_v2  ;;  %v145_v11 = vadd.f32 %v135_v63, %v131_v3 }
  0x8f   :  { %v98_v29 = vmul.f32 %v96_v17, %v56_v21  ;;  %v103_v43 = vmul.f32 %v101_v31, %v62_v25 }
  0x91   :  { %v104_v42 = vadd.f32 %v98_v29, %v93_v28 }
  0x93   :  { %v105_v57 = vadd.f32 %v104_v42, %v103_v43 }
  0x95   :  { %v138_v4 = vmul.f32 %v136_v50, %v105_v57  ;;  %v139_v5 = vmul.f32 %v137_v51, %v105_v57 }
  0x96   :  { %v116_v24 = vpop.permute.xlu1 %115 }
  0x97   :  { %v118_v44 = vmul.f32 %v116_v24, %v56_v21 }
  0x99   :  { %v124_v58 = vadd.f32 %v118_v44, %v113_v41 }
  0x9f   :  { %v121_v55 = vpop.permute.xlu1 %120 }
  0xa0   :  { %v123_v59 = vmul.f32 %v121_v55, %v62_v25 }
  0xa2   :  { %v125_v0 = vadd.f32 %v124_v58, %v123_v59 }
  0xa4   :  { %v142_v6 = vmul.f32 %v140_v56, %v125_v0  ;;  %v143_v7 = vmul.f32 %v141_v60, %v125_v0 }
  0xa6   :  { %v146_v12 = vadd.f32 %v142_v6, %v138_v4  ;;  %v147_v13 = vadd.f32 %v143_v7, %v139_v5 }
  0xa8   :  { %v148_v15 = vadd.f32 %v146_v12, %v144_v10  ;;  %v149_v16 = vadd.f32 %v147_v13, %v145_v11 }
  0xaa   :  { %v150_v17 = vadd.f32 %v148_v15, %v43_v14  ;;  %v151_v18 = vadd.f32 %v149_v16, %v43_v14 }
  0xac   :  { %152 = vst [vmem:[%s250_s5] sm:$0x3f] %v150_v17 }
  0xad   :  { %153 = vst [vmem:[%s250_s5 + $0x8] sm:$0x3f] %v151_v18 }

</bundles_post_ra>
